<compile_context>
chip_gen: v7x
topology: tpu7x:2x2x1
jax: 0.10.0
libtpu: 0.0.40
codegen_flags: <defaults>
</compile_context>

<pallas_src>
import jax
import jax.numpy as jnp
from jax.experimental import pallas as pl
from jax.experimental.pallas import tpu as pltpu

_LANE = 128

# Tri-state cache: None = not yet probed, True/False = whether single-buffered
# (pl.Buffered(1)) resident weight/bias BlockSpecs compile on this jax/TPU.
_SINGLE_BUFFER_PARAMS = None


def _sent_head_kernel(x_ref, w_ref, b_ref, o_ref):
    # x_ref: [TB, H]      (VMEM, pipelined over the batch grid)
    # w_ref: [H, C_pad]   (VMEM, constant index_map -> resident across steps)
    # b_ref: [1, C_pad]   (VMEM, float32, resident)
    # o_ref: [TB, C_pad]  (VMEM, lane-dense output tile)
    acc = jnp.dot(x_ref[...], w_ref[...], preferred_element_type=jnp.float32)
    o_ref[...] = (acc + b_ref[...]).astype(o_ref.dtype)


def prepare_sent_head_params(weight, bias):
    """One-time parameter prep (do at module init, not per forward).

    weight: [C, H] (PyTorch nn.Linear layout); bias: [C].
    Returns:
      w_hc: [H, C_pad]  weight transposed + zero-padded to a 128-lane multiple
      b2d:  [1, C_pad]  float32 bias, zero-padded
    """
    C, H = weight.shape
    c_pad = max(_LANE, pl.cdiv(C, _LANE) * _LANE)
    w_hc = jnp.zeros((H, c_pad), dtype=weight.dtype).at[:, :C].set(weight.T)
    b2d = jnp.zeros((1, c_pad), dtype=jnp.float32).at[:, :C].set(
        bias.astype(jnp.float32))
    return w_hc, b2d


def _min_sublane(dtype):
    """Minimum second-minor tile for a dtype (sublane packing)."""
    return {4: 8, 2: 16, 1: 32}.get(jnp.dtype(dtype).itemsize, 8)


def _vmem_plan():
    """Generation-aware (tile budget, vmem_limit ceiling, assume 2 TCs)."""
    cap = None
    try:
        cap = int(getattr(pltpu.get_tpu_info(), "vmem_capacity_bytes", 0)) or None
    except Exception:
        cap = None
    if cap is None:
        cap = 64 << 20  # unknown -> assume the smallest (v7x-class) part
    if cap <= (96 << 20):
        # v7x-class: 64 MiB/TC physical, 2 TensorCores per chip.  Leave
        # headroom for Mosaic internal scratch; never push the limit to 60 MiB.
        budget = min(max(cap - (20 << 20), 16 << 20), 44 << 20)
        ceiling = min(max(cap - (12 << 20), budget + (4 << 20)), 52 << 20)
        multi_core = True
    else:
        # v5e / v6e: 128 MiB physical VMEM -- use most of it.
        budget = 96 << 20
        ceiling = 100 << 20
        multi_core = False
    return budget, ceiling, multi_core


def _plan_tile(B, H, c_pad, x_bytes, o_bytes, w_bytes, sublane, budget,
               param_bufs, split_batch, tile_b):
    """Pick a batch tile whose VMEM footprint fits `budget`; return (tb, need)."""
    resident = param_bufs * (H * c_pad * w_bytes + c_pad * 4)

    def need(tb):
        # double-buffered x + out tiles, plus resident weight / f32 bias
        return resident + 2 * tb * (H * x_bytes + c_pad * o_bytes)

    if tile_b is None:
        tb = sublane
        for cand in (4096, 2048, 1024, 512, 256, 128, 64, 32, 16, 8):
            if cand >= sublane and need(cand) <= budget:
                tb = cand
                break
        tb = min(tb, B)  # a full-dim block is always legal
        # 2-TensorCore parts: if the whole batch fits one block, split it so
        # the "parallel" batch axis actually gives both cores a grid step.
        if split_batch and tb >= B and B >= 2 * sublane:
            tb = pl.cdiv(pl.cdiv(B, 2), sublane) * sublane
    else:
        tb = max(1, min(int(tile_b), B))
        if tb < B:
            # not a full-dim block -> must be a multiple of the sublane tile
            tb = max(sublane, (tb // sublane) * sublane)
        # Harden the explicit path: shrink until the footprint fits the budget.
        while tb > sublane and need(tb) > budget:
            tb = max(sublane, ((tb // 2) // sublane) * sublane)
        tb = min(tb, B)
    return tb, need(tb)


def _build_call(B, H, c_pad, x_dtype, tb, vmem_limit, single_buffer_params,
                x_bytes, w_bytes, o_bytes):
    if single_buffer_params:
        def param_spec(shape):
            return pl.BlockSpec(shape, lambda i: (0, 0),
                                pipeline_mode=pl.Buffered(1))
    else:
        def param_spec(shape):
            return pl.BlockSpec(shape, lambda i: (0, 0))

    cost = pl.CostEstimate(
        flops=2 * B * H * c_pad,
        transcendentals=0,
        bytes_accessed=(B * H * x_bytes + H * c_pad * w_bytes
                        + B * c_pad * o_bytes),
    )

    return pl.pallas_call(
        _sent_head_kernel,
        out_shape=jax.ShapeDtypeStruct((B, c_pad), x_dtype),
        grid_spec=pltpu.PrefetchScalarGridSpec(
            num_scalar_prefetch=0,
            grid=(pl.cdiv(B, tb),),
            in_specs=[
                pl.BlockSpec((tb, H), lambda i: (i, 0)),   # x: tiled over B
                param_spec((H, c_pad)),                    # weight: resident
                param_spec((1, c_pad)),                    # bias: resident
            ],
            out_specs=pl.BlockSpec((tb, c_pad), lambda i: (i, 0)),
        ),
        compiler_params=pltpu.CompilerParams(
            dimension_semantics=("parallel",),
            vmem_limit_bytes=int(vmem_limit),
        ),
        cost_estimate=cost,
    )


def bert_sent_head(pooled_output, w_hc, b2d, *, num_classes, tile_b=None,
                   slice_output=True):
    """pooled_output: [B, H]; (w_hc, b2d) from prepare_sent_head_params.

    slice_output=False returns the padded [B, c_pad] logits (columns beyond
    num_classes are exact zeros) so large-B callers can skip the extra slice.
    """
    global _SINGLE_BUFFER_PARAMS
    B, H = pooled_output.shape
    c_pad = w_hc.shape[1]
    x_bytes = pooled_output.dtype.itemsize
    o_bytes = x_bytes
    w_bytes = w_hc.dtype.itemsize
    sublane = _min_sublane(pooled_output.dtype)
    budget, ceiling, multi_core = _vmem_plan()

    modes = ([True, False] if _SINGLE_BUFFER_PARAMS is None
             else [_SINGLE_BUFFER_PARAMS])
    out_padded, last_err = None, None
    for single_buf in modes:
        tb, vmem_need = _plan_tile(B, H, c_pad, x_bytes, o_bytes, w_bytes,
                                   sublane, budget,
                                   param_bufs=1 if single_buf else 2,
                                   split_batch=multi_core, tile_b=tile_b)
        vmem_limit = min(max(vmem_need + (8 << 20), 32 << 20), ceiling)
        call = _build_call(B, H, c_pad, pooled_output.dtype, tb, vmem_limit,
                           single_buf, x_bytes, w_bytes, o_bytes)
        try:
            out_padded = call(pooled_output, w_hc, b2d)
            _SINGLE_BUFFER_PARAMS = single_buf
            break
        except Exception as err:  # e.g. Buffered(1) unsupported -> double-buffer
            last_err = err
    if out_padded is None:
        raise last_err

    if slice_output:
        return out_padded[:, :num_classes]
    return out_padded


if __name__ == "__main__":
    # Shapes consistent with the module: batch=2, hidden=32, num_classes=2.
    B, H, C = 2, 32, 2
    key = jax.random.PRNGKey(0)
    kx, kw, kb = jax.random.split(key, 3)

    pooled_output = jax.random.normal(kx, (B, H), dtype=jnp.float32)
    weight = jax.random.normal(kw, (C, H), dtype=jnp.float32) * 0.02  # [C, H]
    bias = jax.random.normal(kb, (C,), dtype=jnp.float32) * 0.02      # [C]

    # One-time parameter prep (equivalent of nn.Linear init).
    w_hc, b2d = prepare_sent_head_params(weight, bias)

    out = jax.block_until_ready(
        bert_sent_head(pooled_output, w_hc, b2d, num_classes=C))
    ref = pooled_output @ weight.T + bias
    assert out.shape == (B, C)
    assert jnp.allclose(out, ref, atol=1e-5, rtol=1e-5), "mismatch vs reference"

    # Tiled / pipelined path: grid > 1, partial last block, explicit tile_b.
    B2, H2 = 300, 128
    x2 = jax.random.normal(jax.random.PRNGKey(1), (B2, H2), dtype=jnp.float32)
    w2 = jax.random.normal(jax.random.PRNGKey(2), (C, H2), dtype=jnp.float32) * 0.02
    b2 = jax.random.normal(jax.random.PRNGKey(3), (C,), dtype=jnp.float32) * 0.02
    w2_hc, b2_2d = prepare_sent_head_params(w2, b2)
    ref2 = x2 @ w2.T + b2

    out2 = jax.block_until_ready(
        bert_sent_head(x2, w2_hc, b2_2d, num_classes=C, tile_b=128))
    assert out2.shape == (B2, C)
    assert jnp.allclose(out2, ref2, atol=1e-4, rtol=1e-4), "tiled path mismatch"

    # Padded-output path (no XLA slice); extra columns must be exact zeros.
    out2_pad = jax.block_until_ready(
        bert_sent_head(x2, w2_hc, b2_2d, num_classes=C, slice_output=False))
    assert out2_pad.shape == (B2, w2_hc.shape[1])
    assert jnp.allclose(out2_pad[:, :C], ref2, atol=1e-4, rtol=1e-4)
    assert jnp.allclose(out2_pad[:, C:], 0.0), "padded logit columns must be 0"

    # bf16 path exercises the 16-row minimum sublane-tile rounding of tile_b.
    B3, H3 = 64, 128
    x3 = jax.random.normal(jax.random.PRNGKey(4), (B3, H3), dtype=jnp.float32)
    w3 = jax.random.normal(jax.random.PRNGKey(5), (C, H3), dtype=jnp.float32) * 0.02
    b3 = jax.random.normal(jax.random.PRNGKey(6), (C,), dtype=jnp.float32) * 0.02
    w3_hc, b3_2d = prepare_sent_head_params(w3.astype(jnp.bfloat16), b3)
    out3 = jax.block_until_ready(
        bert_sent_head(x3.astype(jnp.bfloat16), w3_hc, b3_2d,
                       num_classes=C, tile_b=24))
    ref3 = x3 @ w3.T + b3
    assert out3.shape == (B3, C)
    assert jnp.allclose(out3.astype(jnp.float32), ref3, atol=2e-2, rtol=2e-2), \
        "bf16 path mismatch"

    print("KERNEL_OK")
</pallas_src>

<mosaic_0001>
module attributes {stable_mosaic.version = 11 : i64} {
  func.func @_sent_head_kernel(%arg0: i32, %arg1: memref<2x32xf32, #tpu.memory_space<vmem>>, %arg2: memref<32x128xf32, #tpu.memory_space<vmem>>, %arg3: memref<1x128xf32, #tpu.memory_space<vmem>>, %arg4: memref<2x128xf32, #tpu.memory_space<vmem>>) attributes {dimension_semantics = [#tpu.dimension_semantics<parallel>], iteration_bounds = array<i64: 1>, scalar_prefetch = 0 : i64, scratch_operands = 0 : i64, tpu.core_type = #tpu.core_type<tc>, window_params = [{transform_indices = @transform_0, window_bounds = array<i64: 2, 32>}, {pipeline_mode = #tpu.pipeline_mode<synchronous>, transform_indices = @transform_1, window_bounds = array<i64: 32, 128>}, {pipeline_mode = #tpu.pipeline_mode<synchronous>, transform_indices = @transform_2, window_bounds = array<i64: 1, 128>}, {transform_indices = @transform_3, window_bounds = array<i64: 2, 128>}]} {
    %c0 = arith.constant 0 : index
    %c0_0 = arith.constant 0 : index
    %0 = vector.load %arg1[%c0, %c0_0] : memref<2x32xf32, #tpu.memory_space<vmem>>, vector<2x32xf32>
    %c0_1 = arith.constant 0 : index
    %c0_2 = arith.constant 0 : index
    %1 = vector.load %arg2[%c0_1, %c0_2] : memref<32x128xf32, #tpu.memory_space<vmem>>, vector<32x128xf32>
    %cst = arith.constant dense<0.000000e+00> : vector<2x128xf32>
    %2 = tpu.matmul %0, %1, %cst {dimension_numbers = #tpu.dot_dimension_numbers<[1], [0], [0], [1], [0, 0, 1, 1], [], []>} : vector<2x32xf32>, vector<32x128xf32>, vector<2x128xf32> -> vector<2x128xf32>
    %c0_3 = arith.constant 0 : index
    %c0_4 = arith.constant 0 : index
    %3 = vector.load %arg3[%c0_3, %c0_4] : memref<1x128xf32, #tpu.memory_space<vmem>>, vector<1x128xf32>
    %4 = vector.broadcast %3 : vector<1x128xf32> to vector<2x128xf32>
    %5 = arith.addf %2, %4 : vector<2x128xf32>
    %c0_5 = arith.constant 0 : index
    %c0_6 = arith.constant 0 : index
    %6 = vector.load %arg4[%c0_5, %c0_6] : memref<2x128xf32, #tpu.memory_space<vmem>>, vector<2x128xf32>
    tpu.vector_store %arg4[%c0_5, %c0_6], %5 {strides = array<i32>} : memref<2x128xf32, #tpu.memory_space<vmem>>, vector<2x128xf32>,
    return
  }
  func.func @transform_0(%arg0: i32) -> (i32, i32) {
    %c0_i32 = arith.constant 0 : i32
    %c0_i32_0 = arith.constant 0 : i32
    return %arg0, %c0_i32 : i32, i32
  }
  func.func @transform_1(%arg0: i32) -> (i32, i32) {
    %c0_i32 = arith.constant 0 : i32
    %c0_i32_0 = arith.constant 0 : i32
    %c0_i32_1 = arith.constant 0 : i32
    return %c0_i32, %c0_i32_0 : i32, i32
  }
  func.func @transform_2(%arg0: i32) -> (i32, i32) {
    %c0_i32 = arith.constant 0 : i32
    %c0_i32_0 = arith.constant 0 : i32
    %c0_i32_1 = arith.constant 0 : i32
    return %c0_i32, %c0_i32_0 : i32, i32
  }
  func.func @transform_3(%arg0: i32) -> (i32, i32) {
    %c0_i32 = arith.constant 0 : i32
    %c0_i32_0 = arith.constant 0 : i32
    return %arg0, %c0_i32 : i32, i32
  }
}

module attributes {stable_mosaic.version = 11 : i64} {
  func.func @_sent_head_kernel(%arg0: i32, %arg1: memref<2x32xf32, #tpu.memory_space<vmem>>, %arg2: memref<32x128xf32, #tpu.memory_space<vmem>>, %arg3: memref<1x128xf32, #tpu.memory_space<vmem>>, %arg4: memref<2x128xf32, #tpu.memory_space<vmem>>) attributes {dimension_semantics = [#tpu.dimension_semantics<parallel>], iteration_bounds = array<i64: 1>, scalar_prefetch = 0 : i64, scratch_operands = 0 : i64, tpu.core_type = #tpu.core_type<tc>, window_params = [{transform_indices = @transform_0, window_bounds = array<i64: 2, 32>}, {pipeline_mode = #tpu.pipeline_mode<synchronous>, transform_indices = @transform_1, window_bounds = array<i64: 32, 128>}, {pipeline_mode = #tpu.pipeline_mode<synchronous>, transform_indices = @transform_2, window_bounds = array<i64: 1, 128>}, {transform_indices = @transform_3, window_bounds = array<i64: 2, 128>}]} {
    %c0 = arith.constant 0 : index
    %c0_0 = arith.constant 0 : index
    %0 = vector.load %arg1[%c0, %c0_0] : memref<2x32xf32, #tpu.memory_space<vmem>>, vector<2x32xf32>
    %c0_1 = arith.constant 0 : index
    %c0_2 = arith.constant 0 : index
    %1 = vector.load %arg2[%c0_1, %c0_2] : memref<32x128xf32, #tpu.memory_space<vmem>>, vector<32x128xf32>
    %cst = arith.constant dense<0.000000e+00> : vector<2x128xf32>
    %2 = tpu.matmul %0, %1, %cst {dimension_numbers = #tpu.dot_dimension_numbers<[1], [0], [0], [1], [0, 0, 1, 1], [], []>} : vector<2x32xf32>, vector<32x128xf32>, vector<2x128xf32> -> vector<2x128xf32>
    %c0_3 = arith.constant 0 : index
    %c0_4 = arith.constant 0 : index
    %3 = vector.load %arg3[%c0_3, %c0_4] : memref<1x128xf32, #tpu.memory_space<vmem>>, vector<1x128xf32>
    %4 = vector.broadcast %3 : vector<1x128xf32> to vector<2x128xf32>
    %5 = arith.addf %2, %4 : vector<2x128xf32>
    %c0_5 = arith.constant 0 : index
    %c0_6 = arith.constant 0 : index
    %6 = vector.load %arg4[%c0_5, %c0_6] : memref<2x128xf32, #tpu.memory_space<vmem>>, vector<2x128xf32>
    tpu.vector_store %arg4[%c0_5, %c0_6], %5 {strides = array<i32>} : memref<2x128xf32, #tpu.memory_space<vmem>>, vector<2x128xf32>,
    return
  }
  func.func @transform_0(%arg0: i32) -> (i32, i32) {
    %c0_i32 = arith.constant 0 : i32
    %c0_i32_0 = arith.constant 0 : i32
    return %arg0, %c0_i32 : i32, i32
  }
  func.func @transform_1(%arg0: i32) -> (i32, i32) {
    %c0_i32 = arith.constant 0 : i32
    %c0_i32_0 = arith.constant 0 : i32
    %c0_i32_1 = arith.constant 0 : i32
    return %c0_i32, %c0_i32_0 : i32, i32
  }
  func.func @transform_2(%arg0: i32) -> (i32, i32) {
    %c0_i32 = arith.constant 0 : i32
    %c0_i32_0 = arith.constant 0 : i32
    %c0_i32_1 = arith.constant 0 : i32
    return %c0_i32, %c0_i32_0 : i32, i32
  }
  func.func @transform_3(%arg0: i32) -> (i32, i32) {
    %c0_i32 = arith.constant 0 : i32
    %c0_i32_0 = arith.constant 0 : i32
    return %arg0, %c0_i32 : i32, i32
  }
}

</mosaic_0001>

<bundles_post_ra>
// kernel: tpu_custom_call.1
= control target key start
LH: loop header
LB: loop body
LE: loop exit
PB: predicated region body
PF: predicated region fallthrough
CT: control target
= control target key end

     0   :  { %8 = vsyncpa [#allocation3], 0  ;;  %s322_s0 = inlined_call_operand.hbm [shape: f32[2,32], index: 0, kind: input, shape index: {}]   ;;  %s323_s1 = inlined_call_operand.hbm [shape: f32[32,128], index: 1, kind: input, shape index: {}]   ;;  %s324_s2 = inlined_call_operand.vmem [shape: f32[1,128], index: 2, kind: input, shape index: {}]   ;;  %s325_s3 = inlined_call_operand.hbm [shape: f32[2,128], index: 3, kind: output, shape index: {}]  }
   0x1   :  { %9 = vsyncpa [#allocation6], 0 }
   0x2   :  { %10 = vsyncpa [#allocation4], 0  ;;  %s248_s12 = smov [#allocation2]   ;;  %s249_s14 = smov [#allocation5]  }
   0x3   :  { %s17_s13 = sshll.u32 %s248_s12, 4  ;;  %s26_s15 = sshll.u32 %s249_s14, 4  ;;  %s18_s13 = int_to_ptr.vmem [resolvable:$true] %s17_s13  ;;  %s276_s15 = int_to_ptr.vmem [resolvable:$true] %s26_s15 }
   0x4   :  { %s176_s18 = scalar_lea.hbm %s322_s0, 32 }
   0x5   :  { %p177_p0 = scmp.ne.s32.totalorder %s322_s0, %s176_s18  ;;  %p180_p1 = scmp.lt.u32.totalorder %s176_s18, %s322_s0 }
   0x7   :  { %p182_p2 = pnand %p180_p1, %p177_p0 }
   0x9   :  { %185 = shalt.err (!%p182_p2)
}
   0xa   :  { %s186_s23 = scalar_lea.vmem %s18_s13, 32  ;;  %p191_p4 = scmp.lt.s32.totalorder %s18_s13, %s18_s13 }
   0xb   :  { %p187_p3 = scmp.ne.s32.totalorder %s18_s13, %s186_s23  ;;  %p192_p5 = scmp.lt.s32.totalorder %s186_s23, %s186_s23 }
   0xd   :  { %p193_p6 = por %p192_p5, %p191_p4 }
   0xf   :  { %p194_p7 = pnand %p193_p6, %p187_p3 }
  0x11   :  { %197 = shalt.err (!%p194_p7)
}
  0x12   :  { %20 = dma.hbm_to_vmem [thread:$0]  %s322_s0, 32, %s18_s13, [#allocation3]  }
  0x13   :  { %s198_s28 = scalar_lea.hbm %s323_s1, 512 }
  0x14   :  { %p199_p8 = scmp.ne.s32.totalorder %s323_s1, %s198_s28  ;;  %p202_p9 = scmp.lt.u32.totalorder %s198_s28, %s323_s1 }
  0x16   :  { %p204_p10 = pnand %p202_p9, %p199_p8 }
  0x18   :  { %207 = shalt.err (!%p204_p10)
}
  0x19   :  { %s208_s6 = scalar_lea.vmem %s276_s15, 512  ;;  %p213_p12 = scmp.lt.s32.totalorder %s276_s15, %s276_s15 }
  0x1a   :  { %p209_p11 = scmp.ne.s32.totalorder %s276_s15, %s208_s6  ;;  %p214_p13 = scmp.lt.s32.totalorder %s208_s6, %s208_s6 }
  0x1c   :  { %p215_p0 = por %p214_p13, %p213_p12 }
  0x1e   :  { %p216_p1 = pnand %p215_p0, %p209_p11 }
  0x20   :  { %219 = shalt.err (!%p216_p1)
}
  0x21   :  { %s250_s0 = smov 128   ;;  %s251_s7 = smov 8  }
  0x22   :  { %32 = dma.hbm_to_vmem [thread:$0]  %s323_s1, 512, %s276_s15, [#allocation6], %s250_s0, %s250_s0, %s251_s7  }
  0x23   :  { %242 = dma.done.wait [#allocation3], 32  }
  0x24   :  { %243 = vsyncadd [#allocation3], 4294967264 }
  0x25   :  { %244 = dma.done.wait [#allocation6], 512  }
  0x26   :  { %245 = vsyncadd [#allocation6], 4294966784  ;;  %v252_v0 = vmov 0.0|0.0   ;;  %vm253_vm0 = vmmov 0   ;;  %v254_v1 = vmov 0.0   ;;  %v42_v2 = vld [vmem:[#allocation5] sm:$0xff] }
  0x27   :  { %162 = vmatprep.subr.bf16.mxu0 %v252_v0  ;;  %159 = vmatprep.mubr.msk.f32.mxu0 %vm253_vm0, %v254_v1  ;;  %v43_v3 = vld [vmem:[#allocation5 + $0x8] sm:$0xff]  ;;  %v44_v4 = vld [vmem:[#allocation5 + $0x10] sm:$0xff]  ;;  %v45_v6 = vld [vmem:[#allocation5 + $0x18] sm:$0xff]  ;;  %vm53_vm1 = vcmask 261120   ;;  %s255_s11 = smov [#allocation7]  }
  0x28   :  { %v163_v5 = vpack.c.bf16 %v43_v3, %v42_v2  ;;  %v166_v7 = vpack.c.bf16 %v45_v6, %v44_v4  ;;  %v41_v8 = vld [vmem:[#allocation2] sm:$0x3]  ;;  %s134_s12 = sshll.u32 %s255_s11, 4  ;;  %s135_s12 = int_to_ptr.vmem [resolvable:$true] %s134_s12 }
  0x29   :  { %v144_v9 = vld [vmem:[%s324_s2] ss:$0 sm:$0xff]  ;;  %s220_s13 = scalar_lea.vmem %s135_s12, 32  ;;  %p225_p3 = scmp.lt.s32.totalorder %s135_s12, %s135_s12 }
  0x2a   :  { %164 = vmatpush3.bf16.msra.mxu0 %v163_v5  ;;  %p221_p2 = scmp.ne.s32.totalorder %s135_s12, %s220_s13  ;;  %p226_p4 = scmp.lt.s32.totalorder %s220_s13, %s220_s13 }
  0x2b   :  { %165 = vmatprep.subr.bf16.mxu0 %v252_v0 }
  0x2c   :  { %p227_p5 = por %p226_p4, %p225_p3 }
  0x2e   :  { %167 = vmatpush3.bf16.msra.mxu0 %v166_v7  ;;  %p228_p6 = pnand %p227_p5, %p221_p2 }
  0x31   :  { %160 = vmatmul.mubr.msk.f32.vlgmr.msra.gmra.mrb[0].mxu0 %vm53_vm1, %v41_v8 }
 0x104   :  { %v123_v10 = vpop.f32.mrb[0].mxu0 }
 0x105   :  { %v124_v11 = vadd.f32 %v144_v9, %v123_v10  ;;  %v161_v12 = vpop.f32.mrb[1].mxu0 }
 0x107   :  { %127 = vst [vmem:[#allocation7] sm:$0x3] %v124_v11 }
 0x108   :  { %231 = shalt.err (!%p228_p6)
}
 0x109   :  { %s232_s16 = scalar_lea.hbm %s325_s3, 32 }
 0x10a   :  { %p233_p7 = scmp.ne.s32.totalorder %s325_s3, %s232_s16  ;;  %p236_p8 = scmp.lt.u32.totalorder %s232_s16, %s325_s3 }
 0x10c   :  { %p238_p9 = pnand %p236_p8, %p233_p7 }
 0x10e   :  { %241 = shalt.err (!%p238_p9)
}
 0x10f   :  { %137 = dma.vmem_to_hbm [thread:$0]  %s135_s12, 32, %s325_s3, [#allocation4]  }
 0x110   :  { %246 = dma.done.wait [#allocation4], 32  }
 0x111   :  { %247 = vsyncadd [#allocation4], 4294967264 }
 0x112   :  { %141 = vsyncpa [#allocation3], 1 }
 0x113   :  { %142 = vsyncpa [#allocation6], 1 }
 0x114   :  { %143 = vsyncpa [#allocation4], 1 }

// kernel: tpu_custom_call.1
= control target key start
LH: loop header
LB: loop body
LE: loop exit
PB: predicated region body
PF: predicated region fallthrough
CT: control target
= control target key end

     0   :  { %8 = vsyncpa [#allocation3], 0  ;;  %s322_s0 = inlined_call_operand.hbm [shape: f32[2,32], index: 0, kind: input, shape index: {}]   ;;  %s323_s1 = inlined_call_operand.hbm [shape: f32[32,128], index: 1, kind: input, shape index: {}]   ;;  %s324_s2 = inlined_call_operand.vmem [shape: f32[1,128], index: 2, kind: input, shape index: {}]   ;;  %s325_s3 = inlined_call_operand.hbm [shape: f32[2,128], index: 3, kind: output, shape index: {}]  }
   0x1   :  { %9 = vsyncpa [#allocation6], 0 }
   0x2   :  { %10 = vsyncpa [#allocation4], 0  ;;  %s248_s12 = smov [#allocation2]   ;;  %s249_s14 = smov [#allocation5]  }
   0x3   :  { %s17_s13 = sshll.u32 %s248_s12, 4  ;;  %s26_s15 = sshll.u32 %s249_s14, 4  ;;  %s18_s13 = int_to_ptr.vmem [resolvable:$true] %s17_s13  ;;  %s276_s15 = int_to_ptr.vmem [resolvable:$true] %s26_s15 }
   0x4   :  { %s176_s18 = scalar_lea.hbm %s322_s0, 32 }
   0x5   :  { %p177_p0 = scmp.ne.s32.totalorder %s322_s0, %s176_s18  ;;  %p180_p1 = scmp.lt.u32.totalorder %s176_s18, %s322_s0 }
   0x7   :  { %p182_p2 = pnand %p180_p1, %p177_p0 }
   0x9   :  { %185 = shalt.err (!%p182_p2)
}
   0xa   :  { %s186_s23 = scalar_lea.vmem %s18_s13, 32  ;;  %p191_p4 = scmp.lt.s32.totalorder %s18_s13, %s18_s13 }
   0xb   :  { %p187_p3 = scmp.ne.s32.totalorder %s18_s13, %s186_s23  ;;  %p192_p5 = scmp.lt.s32.totalorder %s186_s23, %s186_s23 }
   0xd   :  { %p193_p6 = por %p192_p5, %p191_p4 }
   0xf   :  { %p194_p7 = pnand %p193_p6, %p187_p3 }
  0x11   :  { %197 = shalt.err (!%p194_p7)
}
  0x12   :  { %20 = dma.hbm_to_vmem [thread:$0]  %s322_s0, 32, %s18_s13, [#allocation3]  }
  0x13   :  { %s198_s28 = scalar_lea.hbm %s323_s1, 512 }
  0x14   :  { %p199_p8 = scmp.ne.s32.totalorder %s323_s1, %s198_s28  ;;  %p202_p9 = scmp.lt.u32.totalorder %s198_s28, %s323_s1 }
  0x16   :  { %p204_p10 = pnand %p202_p9, %p199_p8 }
  0x18   :  { %207 = shalt.err (!%p204_p10)
}
  0x19   :  { %s208_s6 = scalar_lea.vmem %s276_s15, 512  ;;  %p213_p12 = scmp.lt.s32.totalorder %s276_s15, %s276_s15 }
  0x1a   :  { %p209_p11 = scmp.ne.s32.totalorder %s276_s15, %s208_s6  ;;  %p214_p13 = scmp.lt.s32.totalorder %s208_s6, %s208_s6 }
  0x1c   :  { %p215_p0 = por %p214_p13, %p213_p12 }
  0x1e   :  { %p216_p1 = pnand %p215_p0, %p209_p11 }
  0x20   :  { %219 = shalt.err (!%p216_p1)
}
  0x21   :  { %s250_s0 = smov 128   ;;  %s251_s7 = smov 8  }
  0x22   :  { %32 = dma.hbm_to_vmem [thread:$0]  %s323_s1, 512, %s276_s15, [#allocation6], %s250_s0, %s250_s0, %s251_s7  }
  0x23   :  { %242 = dma.done.wait [#allocation3], 32  }
  0x24   :  { %243 = vsyncadd [#allocation3], 4294967264 }
  0x25   :  { %244 = dma.done.wait [#allocation6], 512  }
  0x26   :  { %245 = vsyncadd [#allocation6], 4294966784  ;;  %v252_v0 = vmov 0.0|0.0   ;;  %vm253_vm0 = vmmov 0   ;;  %v254_v1 = vmov 0.0   ;;  %v42_v2 = vld [vmem:[#allocation5] sm:$0xff] }
  0x27   :  { %162 = vmatprep.subr.bf16.mxu0 %v252_v0  ;;  %159 = vmatprep.mubr.msk.f32.mxu0 %vm253_vm0, %v254_v1  ;;  %v43_v3 = vld [vmem:[#allocation5 + $0x8] sm:$0xff]  ;;  %v44_v4 = vld [vmem:[#allocation5 + $0x10] sm:$0xff]  ;;  %v45_v6 = vld [vmem:[#allocation5 + $0x18] sm:$0xff]  ;;  %vm53_vm1 = vcmask 261120   ;;  %s255_s11 = smov [#allocation7]  }
  0x28   :  { %v163_v5 = vpack.c.bf16 %v43_v3, %v42_v2  ;;  %v166_v7 = vpack.c.bf16 %v45_v6, %v44_v4  ;;  %v41_v8 = vld [vmem:[#allocation2] sm:$0x3]  ;;  %s134_s12 = sshll.u32 %s255_s11, 4  ;;  %s135_s12 = int_to_ptr.vmem [resolvable:$true] %s134_s12 }
  0x29   :  { %v144_v9 = vld [vmem:[%s324_s2] ss:$0 sm:$0xff]  ;;  %s220_s13 = scalar_lea.vmem %s135_s12, 32  ;;  %p225_p3 = scmp.lt.s32.totalorder %s135_s12, %s135_s12 }
  0x2a   :  { %164 = vmatpush3.bf16.msra.mxu0 %v163_v5  ;;  %p221_p2 = scmp.ne.s32.totalorder %s135_s12, %s220_s13  ;;  %p226_p4 = scmp.lt.s32.totalorder %s220_s13, %s220_s13 }
  0x2b   :  { %165 = vmatprep.subr.bf16.mxu0 %v252_v0 }
  0x2c   :  { %p227_p5 = por %p226_p4, %p225_p3 }
  0x2e   :  { %167 = vmatpush3.bf16.msra.mxu0 %v166_v7  ;;  %p228_p6 = pnand %p227_p5, %p221_p2 }
  0x31   :  { %160 = vmatmul.mubr.msk.f32.vlgmr.msra.gmra.mrb[0].mxu0 %vm53_vm1, %v41_v8 }
 0x104   :  { %v123_v10 = vpop.f32.mrb[0].mxu0 }
 0x105   :  { %v124_v11 = vadd.f32 %v144_v9, %v123_v10  ;;  %v161_v12 = vpop.f32.mrb[1].mxu0 }
 0x107   :  { %127 = vst [vmem:[#allocation7] sm:$0x3] %v124_v11 }
 0x108   :  { %231 = shalt.err (!%p228_p6)
}
 0x109   :  { %s232_s16 = scalar_lea.hbm %s325_s3, 32 }
 0x10a   :  { %p233_p7 = scmp.ne.s32.totalorder %s325_s3, %s232_s16  ;;  %p236_p8 = scmp.lt.u32.totalorder %s232_s16, %s325_s3 }
 0x10c   :  { %p238_p9 = pnand %p236_p8, %p233_p7 }
 0x10e   :  { %241 = shalt.err (!%p238_p9)
}
 0x10f   :  { %137 = dma.vmem_to_hbm [thread:$0]  %s135_s12, 32, %s325_s3, [#allocation4]  }
 0x110   :  { %246 = dma.done.wait [#allocation4], 32  }
 0x111   :  { %247 = vsyncadd [#allocation4], 4294967264 }
 0x112   :  { %141 = vsyncpa [#allocation3], 1 }
 0x113   :  { %142 = vsyncpa [#allocation6], 1 }
 0x114   :  { %143 = vsyncpa [#allocation4], 1 }

</bundles_post_ra>
